<compile_context>
chip_gen: v6e
topology: v6e:2x2x1
jax: 0.10.0
libtpu: 0.0.40
codegen_flags: <defaults>
</compile_context>

<pallas_src>
import functools

import jax
import jax.numpy as jnp
from jax.experimental import pallas as pl
from jax.experimental.pallas import tpu as pltpu

_LANES = 128
_MAX_WIDTH_FACTOR = 32          # slab last dim <= 32 * 128 = 4096


# --------------------------------------------------------------------------- #
# Hardware-aware configuration
# --------------------------------------------------------------------------- #
@functools.lru_cache(maxsize=None)
def _tpu_config():
    """Returns (target_block_bytes, vmem_limit_bytes, num_tensorcores, fast_path_bytes).

    Defaults are safe for every generation (assume v7x: 64 MiB VMEM, 2 TCs).
    """
    kind = ""
    try:
        kind = jax.devices()[0].device_kind.lower()
    except Exception:
        pass

    vmem_bytes = None
    try:
        vmem_bytes = int(pltpu.get_tpu_info().vmem_capacity_bytes)
    except Exception:
        pass

    is_v7 = "v7" in kind
    # v5e / v6e ("lite") chips have a single TensorCore.
    single_tc = ("lite" in kind) or ("v5e" in kind) or ("v6e" in kind)
    num_cores = 1 if single_tc else 2

    if vmem_bytes is None:
        vmem_bytes = 64 * 1024 * 1024 if is_v7 else 128 * 1024 * 1024

    # Pipeline budget: double-buffered input + output = 4 blocks + headroom.
    # ~48 MiB on v7x (64 MiB physical), ~96 MiB on v5e/v6e (128 MiB physical).
    vmem_limit = min(96 * 1024 * 1024,
                     max(16 * 1024 * 1024, (vmem_bytes * 3) // 4))
    # ~8 MiB blocks on v7x, up to 12 MiB where VMEM allows.
    target_block = min(12 * 1024 * 1024,
                       max(4 * 1024 * 1024, vmem_limit // 6))
    # Below this, let XLA fuse ReLU into its producer (kernel can at best tie).
    fast_path_bytes = 2 * 1024 * 1024 if is_v7 else 1 * 1024 * 1024
    return target_block, vmem_limit, num_cores, fast_path_bytes


# --------------------------------------------------------------------------- #
# Tiling helpers
# --------------------------------------------------------------------------- #
def _sublane_multiple(itemsize: int) -> int:
    # Legal second-to-last block dim granularity: 8 (f32), 16 (bf16), 32 (i8/fp8).
    return 8 * max(1, 4 // max(1, itemsize))


def _pick_slab_width(n: int) -> int:
    """Widest last dim W = 128*d (d <= 32) dividing n (n is a multiple of 128)."""
    m = n // _LANES
    for d in range(min(_MAX_WIDTH_FACTOR, m), 0, -1):
        if m % d == 0:
            return _LANES * d
    return _LANES


def _divisors_in_range(n: int, lo: int, hi: int):
    """Divisors of n in [lo, hi], largest first."""
    out = set()
    i = 1
    while i * i <= n:
        if n % i == 0:
            for d in (i, n // i):
                if lo <= d <= hi:
                    out.add(d)
        i += 1
    return sorted(out, reverse=True)


def _pick_block_rows(rows: int, width: int, itemsize: int,
                     target_block_bytes: int, num_cores: int) -> int:
    """Block row count: ~target-sized blocks, legal sublane multiple, and a grid
    shaped so multi-TC chips get balanced work and blocks stay uniform."""
    sub = _sublane_multiple(itemsize)
    if rows <= sub:
        return rows  # full second-to-last dim is always a legal block dim

    row_bytes = width * itemsize
    target = max(sub, (target_block_bytes // row_bytes) // sub * sub)

    if target >= rows:
        if num_cores <= 1:
            return rows  # single TC: one full-size block, one step (no halving)
        # Multi-TC: split evenly across cores; prefer a divisor (uniform blocks).
        block = pl.cdiv(pl.cdiv(rows, num_cores), sub) * sub
        for d in _divisors_in_range(rows, max(sub, block // 2), block):
            if d % sub == 0 and (rows // d) % num_cores == 0:
                return d
        return min(rows, block)

    # Multi-step grid: prefer a divisor of rows near target (no partial final
    # block); on multi-TC chips also prefer a step count divisible by num_cores.
    cands = [d for d in _divisors_in_range(rows, max(sub, target // 2), target)
             if d % sub == 0]
    for d in cands:
        if num_cores <= 1 or (rows // d) % num_cores == 0:
            return d
    if cands:
        return cands[0]
    # Fallback: target-sized blocks; bump step count to a multiple of num_cores.
    steps = pl.cdiv(rows, target)
    if num_cores > 1:
        steps = pl.cdiv(steps, num_cores) * num_cores
    return min(rows, max(sub, pl.cdiv(pl.cdiv(rows, steps), sub) * sub))


# --------------------------------------------------------------------------- #
# Kernel
# --------------------------------------------------------------------------- #
def _relu_kernel(x_ref, o_ref):
    # Pure elementwise max(x, 0) on the whole VMEM tile (VPU).
    o_ref[...] = jnp.maximum(x_ref[...], jnp.zeros((), x_ref.dtype))


def _relu_pallas_2d(slab: jax.Array, *, donate: bool) -> jax.Array:
    rows, width = slab.shape
    itemsize = slab.dtype.itemsize
    target_block, vmem_limit, num_cores, _ = _tpu_config()
    block_rows = _pick_block_rows(rows, width, itemsize, target_block, num_cores)
    grid = (pl.cdiv(rows, block_rows),)

    extra = {}
    if donate:
        # In-place ReLU: same HBM traffic (still 1 read + 1 write), but halves
        # peak HBM footprint. Only requested when the caller donates the input,
        # otherwise XLA would insert a defensive copy (extra HBM pass).
        extra["input_output_aliases"] = {0: 0}

    return pl.pallas_call(
        _relu_kernel,
        out_shape=jax.ShapeDtypeStruct((rows, width), slab.dtype),
        grid_spec=pltpu.PrefetchScalarGridSpec(
            num_scalar_prefetch=0,
            grid=grid,
            in_specs=[pl.BlockSpec((block_rows, width), lambda i: (i, 0))],
            out_specs=pl.BlockSpec((block_rows, width), lambda i: (i, 0)),
        ),
        compiler_params=pltpu.CompilerParams(
            dimension_semantics=("parallel",),
            vmem_limit_bytes=vmem_limit,
        ),
        **extra,
    )(slab)


def relu(x: jax.Array, *, force_kernel: bool = False,
         donate: bool = False) -> jax.Array:
    """Elementwise ReLU, identical semantics to torch.nn.functional.relu."""
    n = x.size
    if n == 0:
        return x
    itemsize = x.dtype.itemsize
    _, _, _, fast_path_bytes = _tpu_config()
    ragged = (n % _LANES) != 0
    tiny = n * itemsize < fast_path_bytes
    if ragged or (tiny and not force_kernel):
        # Tiny tensors: pallas_call fixed cost dominates and XLA can fuse the
        # maximum into its producer (saving one full HBM read+write).
        # Ragged sizes: padding would add HBM passes; hand them to XLA instead.
        return jnp.maximum(x, jnp.zeros((), x.dtype))
    width = _pick_slab_width(n)
    slab = x.reshape(n // width, width)   # metadata-only reshape, no pad / copy
    out = _relu_pallas_2d(slab, donate=donate)
    return out.reshape(x.shape)


# --------------------------------------------------------------------------- #
# Self-test
# --------------------------------------------------------------------------- #
if __name__ == "__main__":
    key = jax.random.PRNGKey(0)
    k1, k2, k3, k4 = jax.random.split(key, 4)

    # Small NCHW activation matching the module's typical use: batch=2, C=4, H=W=16.
    x = jax.random.normal(k1, (2, 4, 16, 16), dtype=jnp.float32)
    y = jax.block_until_ready(relu(x, force_kernel=True))  # exercise Pallas path
    assert y.shape == x.shape and y.dtype == x.dtype
    assert jnp.allclose(y, jnp.maximum(x, 0.0)), "mismatch vs reference ReLU (small)"

    # Moderately larger aligned tensor: exercises a multi-block pipelined grid.
    x_med = jax.random.normal(k2, (4, 16, 64, 64), dtype=jnp.float32)
    y_med = jax.block_until_ready(relu(x_med, force_kernel=True))
    assert jnp.allclose(y_med, jnp.maximum(x_med, 0.0)), "mismatch (medium)"

    # Donated / aliased (in-place output buffer) path under jit.
    x_alias = jax.random.normal(k3, (4, 16, 64, 64), dtype=jnp.float32)
    expected_alias = jnp.maximum(x_alias, 0.0)
    relu_inplace = jax.jit(lambda t: relu(t, force_kernel=True, donate=True),
                           donate_argnums=0)
    y_alias = jax.block_until_ready(relu_inplace(x_alias))
    assert jnp.allclose(y_alias, expected_alias), "mismatch (aliased)"

    # Ragged / tiny fast path (plain XLA maximum) still matches.
    x_rag = jax.random.normal(k4, (3, 5, 7), dtype=jnp.float32)
    y_rag = jax.block_until_ready(relu(x_rag))
    assert jnp.allclose(y_rag, jnp.maximum(x_rag, 0.0)), "mismatch (ragged)"

    print("KERNEL_OK")
</pallas_src>

<mosaic_0001>
module attributes {stable_mosaic.version = 11 : i64} {
  func.func @_relu_kernel(%arg0: i32, %arg1: memref<1x2048xf32, #tpu.memory_space<vmem>>, %arg2: memref<1x2048xf32, #tpu.memory_space<vmem>>) attributes {dimension_semantics = [#tpu.dimension_semantics<parallel>], iteration_bounds = array<i64: 1>, scalar_prefetch = 0 : i64, scratch_operands = 0 : i64, tpu.core_type = #tpu.core_type<tc>, window_params = [{transform_indices = @transform_0, window_bounds = array<i64: 1, 2048>}, {transform_indices = @transform_1, window_bounds = array<i64: 1, 2048>}]} {
    %c0 = arith.constant 0 : index
    %c0_0 = arith.constant 0 : index
    %0 = vector.load %arg1[%c0, %c0_0] : memref<1x2048xf32, #tpu.memory_space<vmem>>, vector<1x2048xf32>
    %cst = arith.constant 0.000000e+00 : f32
    %1 = vector.broadcast %cst : f32 to vector<1x2048xf32>
    %2 = arith.maximumf %0, %1 : vector<1x2048xf32>
    %c0_1 = arith.constant 0 : index
    %c0_2 = arith.constant 0 : index
    %3 = vector.load %arg2[%c0_1, %c0_2] : memref<1x2048xf32, #tpu.memory_space<vmem>>, vector<1x2048xf32>
    tpu.vector_store %arg2[%c0_1, %c0_2], %2 {strides = array<i32>} : memref<1x2048xf32, #tpu.memory_space<vmem>>, vector<1x2048xf32>,
    return
  }
  func.func @transform_0(%arg0: i32) -> (i32, i32) {
    %c0_i32 = arith.constant 0 : i32
    %c0_i32_0 = arith.constant 0 : i32
    return %arg0, %c0_i32 : i32, i32
  }
  func.func @transform_1(%arg0: i32) -> (i32, i32) {
    %c0_i32 = arith.constant 0 : i32
    %c0_i32_0 = arith.constant 0 : i32
    return %arg0, %c0_i32 : i32, i32
  }
}

</mosaic_0001>

<bundles_post_ra>
// kernel: tpu_custom_call.1
= control target key start
LH: loop header
LB: loop body
LE: loop exit
PB: predicated region body
PF: predicated region fallthrough
CT: control target
= control target key end

     0   :  { %6 = vsyncpa [#allocation3], 0  ;;  %s106_s0 = inlined_call_operand.hbm [shape: f32[1,2048], index: 0, kind: input, shape index: {}]   ;;  %s107_s1 = inlined_call_operand.hbm [shape: f32[1,2048], index: 1, kind: output, shape index: {}]  }
   0x1   :  { %7 = vsyncpa [#allocation4], 0  ;;  %s88_s6 = smov [#allocation2]  }
   0x2   :  { %s14_s7 = sshll.u32 %s88_s6, 4  ;;  %s15_s7 = int_to_ptr.vmem [resolvable:$true] %s14_s7 }
   0x3   :  { %s52_s8 = scalar_lea.vmem %s15_s7, 256  ;;  %p57_p1 = scmp.lt.s32.totalorder %s15_s7, %s15_s7 }
   0x4   :  { %p53_p0 = scmp.ne.s32.totalorder %s15_s7, %s52_s8  ;;  %p58_p2 = scmp.lt.s32.totalorder %s52_s8, %s52_s8 }
   0x6   :  { %p59_p3 = por %p58_p2, %p57_p1 }
   0x8   :  { %p60_p4 = pnand %p59_p3, %p53_p0 }
   0xa   :  { %63 = shalt.err (!%p60_p4)
}
   0xb   :  { %17 = dma.hbm_to_vmem [thread:$0]  %s106_s0, 256, %s15_s7, [#allocation3]  }
   0xc   :  { %84 = dma.done.wait [#allocation3], 256  }
   0xd   :  { %85 = vsyncadd [#allocation3], 4294967040  ;;  %s89_s11 = smov [#allocation5]   ;;  %v21_v0 = vld [vmem:[#allocation2] sm:$0xff]  ;;  %v22_v1 = vld [vmem:[#allocation2 + $0x8] sm:$0xff] }
   0xe   :  { %s33_s12 = sshll.u32 %s89_s11, 4  ;;  %v23_v2 = vmax.f32 %v21_v0, 0.0  ;;  %v24_v3 = vmax.f32 %v22_v1, 0.0  ;;  %s34_s12 = int_to_ptr.vmem [resolvable:$true] %s33_s12 }
   0xf   :  { %s64_s13 = scalar_lea.vmem %s34_s12, 256  ;;  %p69_p6 = scmp.lt.s32.totalorder %s34_s12, %s34_s12 }
  0x10   :  { %25 = vst [vmem:[#allocation5] sm:$0xff] %v23_v2  ;;  %26 = vst [vmem:[#allocation5 + $0x8] sm:$0xff] %v24_v3  ;;  %p65_p5 = scmp.ne.s32.totalorder %s34_s12, %s64_s13  ;;  %p70_p7 = scmp.lt.s32.totalorder %s64_s13, %s64_s13 }
  0x12   :  { %p71_p8 = por %p70_p7, %p69_p6 }
  0x14   :  { %p72_p9 = pnand %p71_p8, %p65_p5 }
  0x16   :  { %75 = shalt.err (!%p72_p9)
}
  0x17   :  { %36 = dma.vmem_to_hbm [thread:$0]  %s34_s12, 256, %s107_s1, [#allocation4]  }
  0x18   :  { %86 = dma.done.wait [#allocation4], 256  }
  0x19   :  { %87 = vsyncadd [#allocation4], 4294967040 }
  0x1a   :  { %40 = vsyncpa [#allocation3], 1 }
  0x1b   :  { %41 = vsyncpa [#allocation4], 1 }

</bundles_post_ra>
